<compile_context>
chip_gen: v7x
topology: tpu7x:2x2x1
jax: 0.10.0
libtpu: 0.0.40
codegen_flags: <defaults>
</compile_context>

<pallas_src>
import functools

import jax
import jax.numpy as jnp
from jax.experimental import pallas as pl
from jax.experimental.pallas import tpu as pltpu


def _round_up(x, m):
    return ((x + m - 1) // m) * m


def _cdiv(a, b):
    return (a + b - 1) // b


def _pad_to(a, shape):
    pads = [(0, t - s) for t, s in zip(shape, a.shape)]
    return jnp.pad(a, pads)


def _vmem_capacity_bytes():
    # Per-core VMEM: 128 MiB on v5e/v6e, 64 MiB on v7x.  Query at trace time;
    # fall back to the most conservative (v7x) figure if the query fails.
    try:
        return int(pltpu.get_tpu_info().vmem_capacity_bytes)
    except Exception:  # pragma: no cover - defensive
        return 64 * 2 ** 20


# ---------------------------------------------------------------------------
# Fused path: all three layers in one kernel, weights VMEM-resident.
# ---------------------------------------------------------------------------
def prior_disc_kernel(x_ref, w0_ref, b0_ref, w1_ref, b1_ref, w2_ref, b2_ref,
                      o_ref):
    """One batch tile of the fused 3-layer MLP.

    x_ref:  [TB, Dp]  bf16  batch tile (pipelined, double-buffered)
    w0_ref: [Dp, Dp]  bf16  VMEM-resident (constant block index, Buffered(1))
    b0_ref: [1,  Dp]  f32
    w1_ref: [Dp, Dp]  bf16
    b1_ref: [1,  Dp]  f32
    w2_ref: [Dp, 128] bf16  only column 0 is real, rest zero-padded
    b2_ref: [1, 1]    f32   scalar in SMEM
    o_ref:  [TB, 128] f32/bf16  lane-dense output; column 0 holds the result
    """
    # Layer 0: Linear + ReLU  (bf16 MXU operands, f32 accumulate/elementwise)
    h = jnp.dot(x_ref[...], w0_ref[...], preferred_element_type=jnp.float32)
    h = jnp.maximum(h + b0_ref[...], 0.0)
    # Layer 1: Linear + ReLU
    h = jnp.dot(h.astype(jnp.bfloat16), w1_ref[...],
                preferred_element_type=jnp.float32)
    h = jnp.maximum(h + b1_ref[...], 0.0)
    # Layer 2: Linear (lane-padded to 128 cols) + Sigmoid
    logit = jnp.dot(h.astype(jnp.bfloat16), w2_ref[...],
                    preferred_element_type=jnp.float32)
    logit = logit + b2_ref[0, 0]
    o_ref[...] = jax.nn.sigmoid(logit).astype(o_ref.dtype)


# ---------------------------------------------------------------------------
# Streamed-K fallback: one Linear(+activation) per pallas_call, K innermost.
# ---------------------------------------------------------------------------
def _linear_act_kernel(x_ref, w_ref, b_ref, o_ref, acc_ref, *, activation):
    k = pl.program_id(2)

    @pl.when(k == 0)
    def _():
        acc_ref[...] = jnp.zeros_like(acc_ref)

    acc_ref[...] += jnp.dot(x_ref[...], w_ref[...],
                            preferred_element_type=jnp.float32)

    @pl.when(k == pl.num_programs(2) - 1)
    def _():
        r = acc_ref[...] + b_ref[...]
        if activation == "relu":
            r = jnp.maximum(r, 0.0)
        elif activation == "sigmoid":
            r = jax.nn.sigmoid(r)
        o_ref[...] = r.astype(o_ref.dtype)


def _streamed_linear(xp, wp, bp, activation, out_dtype, *, tm, tn, tk):
    M, K = xp.shape
    _, N = wp.shape
    grid = (M // tm, N // tn, K // tk)
    kern = functools.partial(_linear_act_kernel, activation=activation)
    return pl.pallas_call(
        kern,
        out_shape=jax.ShapeDtypeStruct((M, N), out_dtype),
        grid=grid,
        in_specs=[
            pl.BlockSpec((tm, tk), lambda i, j, k: (i, k)),
            pl.BlockSpec((tk, tn), lambda i, j, k: (k, j)),
            pl.BlockSpec((1, tn), lambda i, j, k: (0, j)),
        ],
        out_specs=pl.BlockSpec((tm, tn), lambda i, j, k: (i, j)),
        scratch_shapes=[pltpu.VMEM((tm, tn), jnp.float32)],
        compiler_params=pltpu.CompilerParams(
            dimension_semantics=("parallel", "parallel", "arbitrary")),
    )(xp, wp, bp)


def _largest_divisor_tile(dim, candidates):
    for c in candidates:
        if dim % c == 0:
            return c
    return dim


# ---------------------------------------------------------------------------
# Public wrapper.
# ---------------------------------------------------------------------------
def prior_discriminator(x, w0, b0, w1, b1, w2, b2, *, block_rows=None,
                        force_streamed=False):
    """Fused PriorDiscriminator forward pass.

    x:  [B, D] float32
    w0: [D, D], b0: [1, D]
    w1: [D, D], b1: [1, D]
    w2: [D, 1], b2: [1, 1]
    returns: [B, 1] in x.dtype, values in (0, 1)
    """
    B, D = x.shape
    Dp = _round_up(D, 128)                      # lane-align the feature dim

    # Output dtype: bf16 when the output stream is a meaningful fraction of
    # total HBM traffic (small D); f32 otherwise.
    out_dtype = jnp.bfloat16 if Dp <= 256 else jnp.float32
    out_bytes = 2 if out_dtype == jnp.bfloat16 else 4

    # Zero-pad: padded rows/cols of the weights are zero, so padded features
    # stay exactly 0 through bias+ReLU and contribute nothing to the output.
    w0p = _pad_to(jnp.asarray(w0), (Dp, Dp)).astype(jnp.bfloat16)
    b0p = _pad_to(jnp.reshape(jnp.asarray(b0), (1, D)), (1, Dp)).astype(jnp.float32)
    w1p = _pad_to(jnp.asarray(w1), (Dp, Dp)).astype(jnp.bfloat16)
    b1p = _pad_to(jnp.reshape(jnp.asarray(b1), (1, D)), (1, Dp)).astype(jnp.float32)
    w2p = _pad_to(jnp.asarray(w2), (Dp, 128)).astype(jnp.bfloat16)
    b2p = jnp.asarray(b2, jnp.float32).reshape(1, 1)

    # VMEM budgeting (single-buffered resident weights, double-buffered tiles).
    vmem_cap = _vmem_capacity_bytes()
    budget = int(0.85 * vmem_cap)               # headroom for Mosaic scratch
    w_resident_bytes = ((w0p.size + w1p.size + w2p.size) * 2
                        + (b0p.size + b1p.size) * 4)
    # per-batch-row VMEM: 2x bf16 x tile, 2x out tile, f32 activation slack.
    per_row = 2 * (Dp * 2) + 2 * (128 * out_bytes) + 4 * Dp * 4

    use_fused = (not force_streamed) and (w_resident_bytes + 8 * per_row <= budget)

    if use_fused:
        # Adaptive batch tile: biggest that fits the budget, but capped at
        # ~ceil(B/2) so the grid has >= 2 steps (megacore sharding on v7x).
        tb_fit = 8
        for c in (2048, 1024, 512, 256, 128, 64, 32, 16, 8):
            if w_resident_bytes + c * per_row <= budget:
                tb_fit = c
                break
        tb_cap = max(8, _round_up(_cdiv(B, 2), 8))
        TB = max(8, min(tb_fit, tb_cap))
        if block_rows is not None:
            TB = max(8, min(TB, _round_up(block_rows, 8)))
        Bp = _round_up(B, TB)
        grid = (Bp // TB,)

        xp = _pad_to(jnp.asarray(x), (Bp, Dp)).astype(jnp.bfloat16)

        vmem_est = (
            w_resident_bytes
            + 2 * (TB * Dp * 2 + TB * 128 * out_bytes)   # double-buffered x/out
            + 4 * TB * Dp * 4                            # f32 activation slack
        )
        vmem_limit = int(min(max(int(1.25 * vmem_est), 16 * 2 ** 20), budget))

        flops = 2 * Bp * (Dp * Dp + Dp * Dp + Dp * 128)
        bytes_accessed = (w_resident_bytes + xp.size * 2 + Bp * 128 * out_bytes)
        cost = pl.CostEstimate(flops=flops,
                               transcendentals=Bp * 128,
                               bytes_accessed=bytes_accessed)

        resident = dict(pipeline_mode=pl.Buffered(1))   # single-buffer weights
        out = pl.pallas_call(
            prior_disc_kernel,
            out_shape=jax.ShapeDtypeStruct((Bp, 128), out_dtype),
            grid=grid,
            in_specs=[
                pl.BlockSpec((TB, Dp), lambda i: (i, 0)),               # x tile
                pl.BlockSpec((Dp, Dp), lambda i: (0, 0), **resident),   # w0
                pl.BlockSpec((1, Dp), lambda i: (0, 0), **resident),    # b0
                pl.BlockSpec((Dp, Dp), lambda i: (0, 0), **resident),   # w1
                pl.BlockSpec((1, Dp), lambda i: (0, 0), **resident),    # b1
                pl.BlockSpec((Dp, 128), lambda i: (0, 0), **resident),  # w2
                pl.BlockSpec(memory_space=pltpu.MemorySpace.SMEM),      # b2
            ],
            out_specs=pl.BlockSpec((TB, 128), lambda i: (i, 0)),
            compiler_params=pltpu.CompilerParams(
                dimension_semantics=("parallel",),
                vmem_limit_bytes=vmem_limit,
            ),
            cost_estimate=cost,
        )(xp, w0p, b0p, w1p, b1p, w2p, b2p)

        return out[:B, :1].astype(x.dtype)

    # ---------------- Large-D / forced fallback: streamed-K per layer -------
    TBs = max(8, min(256, _round_up(B, 8)))
    if block_rows is not None:
        TBs = max(8, min(TBs, _round_up(block_rows, 8)))
    Bp = _round_up(B, TBs)
    xp = _pad_to(jnp.asarray(x), (Bp, Dp)).astype(jnp.bfloat16)
    tk = _largest_divisor_tile(Dp, (512, 256, 128))
    tn = _largest_divisor_tile(Dp, (512, 256, 128))
    b2row = _pad_to(b2p, (1, 128))

    h = _streamed_linear(xp, w0p, b0p, "relu", jnp.bfloat16,
                         tm=TBs, tn=tn, tk=tk)
    h = _streamed_linear(h, w1p, b1p, "relu", jnp.bfloat16,
                         tm=TBs, tn=tn, tk=tk)
    out = _streamed_linear(h, w2p, b2row, "sigmoid", out_dtype,
                           tm=TBs, tn=128, tk=tk)
    return out[:B, :1].astype(x.dtype)


# ---------------------------------------------------------------------------
# Parameter init / reference.
# ---------------------------------------------------------------------------
def init_params(key, input_dim):
    """Deterministic init mimicking nn.Linear's U(-1/sqrt(fan_in), 1/sqrt(fan_in))."""
    ks = jax.random.split(key, 6)

    def lin(kw, kb, fan_in, fan_out):
        bound = 1.0 / jnp.sqrt(fan_in)
        w = jax.random.uniform(kw, (fan_in, fan_out), jnp.float32, -bound, bound)
        b = jax.random.uniform(kb, (1, fan_out), jnp.float32, -bound, bound)
        return w, b

    w0, b0 = lin(ks[0], ks[1], input_dim, input_dim)
    w1, b1 = lin(ks[2], ks[3], input_dim, input_dim)
    w2, b2 = lin(ks[4], ks[5], input_dim, 1)
    return w0, b0, w1, b1, w2, b2


def reference_forward(x, w0, b0, w1, b1, w2, b2):
    h = jax.nn.relu(x @ w0 + b0)
    h = jax.nn.relu(h @ w1 + b1)
    return jax.nn.sigmoid(h @ w2 + b2)


if __name__ == "__main__":
    key = jax.random.PRNGKey(0)
    k_x, k_p, k_x2, k_p2 = jax.random.split(key, 4)

    # Small demo shape matching the module (batch=8, input_dim=32).
    B, D = 8, 32
    x = jax.random.normal(k_x, (B, D), jnp.float32)
    params = init_params(k_p, D)

    out = jax.block_until_ready(prior_discriminator(x, *params))
    ref = reference_forward(x, *params)
    assert out.shape == (B, 1), out.shape
    assert bool(jnp.all(jnp.isfinite(out)))
    # bf16 MXU operands / bf16 output lane -> loosened tolerance vs f32 ref.
    assert jnp.allclose(out, ref, atol=2e-2, rtol=2e-2), "mismatch vs reference"

    # Multi-step grid + padding (B not multiple of TB, D not multiple of 128).
    B2, D2 = 300, 96
    x2 = jax.random.normal(k_x2, (B2, D2), jnp.float32)
    params2 = init_params(k_p2, D2)
    out2 = jax.block_until_ready(prior_discriminator(x2, *params2))
    ref2 = reference_forward(x2, *params2)
    assert out2.shape == (B2, 1), out2.shape
    assert jnp.allclose(out2, ref2, atol=2e-2, rtol=2e-2), "mismatch (tiled)"

    # Exercise the large-D streamed-K fallback path on small shapes.
    out3 = jax.block_until_ready(
        prior_discriminator(x2, *params2, force_streamed=True))
    assert out3.shape == (B2, 1), out3.shape
    assert jnp.allclose(out3, ref2, atol=2e-2, rtol=2e-2), "mismatch (streamed)"

    print("KERNEL_OK")
</pallas_src>

<mosaic_0001>
module attributes {stable_mosaic.version = 11 : i64} {
  func.func @prior_disc_kernel(%arg0: i32, %arg1: memref<8x128xbf16, #tpu.memory_space<vmem>>, %arg2: memref<128x128xbf16, #tpu.memory_space<vmem>>, %arg3: memref<1x128xf32, #tpu.memory_space<vmem>>, %arg4: memref<128x128xbf16, #tpu.memory_space<vmem>>, %arg5: memref<1x128xf32, #tpu.memory_space<vmem>>, %arg6: memref<128x128xbf16, #tpu.memory_space<vmem>>, %arg7: memref<1x1xf32, #tpu.memory_space<smem>>, %arg8: memref<8x128xbf16, #tpu.memory_space<vmem>>) attributes {dimension_semantics = [#tpu.dimension_semantics<parallel>], iteration_bounds = array<i64: 1>, scalar_prefetch = 0 : i64, scratch_operands = 0 : i64, tpu.core_type = #tpu.core_type<tc>, window_params = [{transform_indices = @transform_0, window_bounds = array<i64: 8, 128>}, {pipeline_mode = #tpu.pipeline_mode<synchronous>, transform_indices = @transform_1, window_bounds = array<i64: 128, 128>}, {pipeline_mode = #tpu.pipeline_mode<synchronous>, transform_indices = @transform_2, window_bounds = array<i64: 1, 128>}, {pipeline_mode = #tpu.pipeline_mode<synchronous>, transform_indices = @transform_3, window_bounds = array<i64: 128, 128>}, {pipeline_mode = #tpu.pipeline_mode<synchronous>, transform_indices = @transform_4, window_bounds = array<i64: 1, 128>}, {pipeline_mode = #tpu.pipeline_mode<synchronous>, transform_indices = @transform_5, window_bounds = array<i64: 128, 128>}, {transform_indices = @transform_6, window_bounds = array<i64: 1, 1>}, {transform_indices = @transform_7, window_bounds = array<i64: 8, 128>}]} {
    %c0 = arith.constant 0 : index
    %c0_0 = arith.constant 0 : index
    %0 = vector.load %arg1[%c0, %c0_0] : memref<8x128xbf16, #tpu.memory_space<vmem>>, vector<8x128xbf16>
    %c0_1 = arith.constant 0 : index
    %c0_2 = arith.constant 0 : index
    %1 = vector.load %arg2[%c0_1, %c0_2] : memref<128x128xbf16, #tpu.memory_space<vmem>>, vector<128x128xbf16>
    %cst = arith.constant dense<0.000000e+00> : vector<8x128xf32>
    %2 = tpu.matmul %0, %1, %cst {dimension_numbers = #tpu.dot_dimension_numbers<[1], [0], [0], [1], [0, 0, 1, 1], [], []>} : vector<8x128xbf16>, vector<128x128xbf16>, vector<8x128xf32> -> vector<8x128xf32>
    %c0_3 = arith.constant 0 : index
    %c0_4 = arith.constant 0 : index
    %3 = vector.load %arg3[%c0_3, %c0_4] : memref<1x128xf32, #tpu.memory_space<vmem>>, vector<1x128xf32>
    %4 = vector.broadcast %3 : vector<1x128xf32> to vector<8x128xf32>
    %5 = arith.addf %2, %4 : vector<8x128xf32>
    %cst_5 = arith.constant 0.000000e+00 : f32
    %6 = vector.broadcast %cst_5 : f32 to vector<8x128xf32>
    %7 = arith.maximumf %5, %6 : vector<8x128xf32>
    %8 = arith.truncf %7 : vector<8x128xf32> to vector<8x128xbf16>
    %c0_6 = arith.constant 0 : index
    %c0_7 = arith.constant 0 : index
    %9 = vector.load %arg4[%c0_6, %c0_7] : memref<128x128xbf16, #tpu.memory_space<vmem>>, vector<128x128xbf16>
    %cst_8 = arith.constant dense<0.000000e+00> : vector<8x128xf32>
    %10 = tpu.matmul %8, %9, %cst_8 {dimension_numbers = #tpu.dot_dimension_numbers<[1], [0], [0], [1], [0, 0, 1, 1], [], []>} : vector<8x128xbf16>, vector<128x128xbf16>, vector<8x128xf32> -> vector<8x128xf32>
    %c0_9 = arith.constant 0 : index
    %c0_10 = arith.constant 0 : index
    %11 = vector.load %arg5[%c0_9, %c0_10] : memref<1x128xf32, #tpu.memory_space<vmem>>, vector<1x128xf32>
    %12 = vector.broadcast %11 : vector<1x128xf32> to vector<8x128xf32>
    %13 = arith.addf %10, %12 : vector<8x128xf32>
    %cst_11 = arith.constant 0.000000e+00 : f32
    %14 = vector.broadcast %cst_11 : f32 to vector<8x128xf32>
    %15 = arith.maximumf %13, %14 : vector<8x128xf32>
    %16 = arith.truncf %15 : vector<8x128xf32> to vector<8x128xbf16>
    %c0_12 = arith.constant 0 : index
    %c0_13 = arith.constant 0 : index
    %17 = vector.load %arg6[%c0_12, %c0_13] : memref<128x128xbf16, #tpu.memory_space<vmem>>, vector<128x128xbf16>
    %cst_14 = arith.constant dense<0.000000e+00> : vector<8x128xf32>
    %18 = tpu.matmul %16, %17, %cst_14 {dimension_numbers = #tpu.dot_dimension_numbers<[1], [0], [0], [1], [0, 0, 1, 1], [], []>} : vector<8x128xbf16>, vector<128x128xbf16>, vector<8x128xf32> -> vector<8x128xf32>
    %c0_15 = arith.constant 0 : index
    %c0_16 = arith.constant 0 : index
    %19 = memref.load %arg7[%c0_15, %c0_16] : memref<1x1xf32, #tpu.memory_space<smem>>
    %20 = vector.broadcast %19 : f32 to vector<8x128xf32>
    %21 = arith.addf %18, %20 : vector<8x128xf32>
    %22 = arith.negf %21 : vector<8x128xf32>
    %23 = math.exp %22 : vector<8x128xf32>
    %cst_17 = arith.constant 1.000000e+00 : f32
    %24 = vector.broadcast %cst_17 : f32 to vector<8x128xf32>
    %25 = arith.addf %24, %23 : vector<8x128xf32>
    %26 = arith.divf %24, %25 : vector<8x128xf32>
    %27 = arith.truncf %26 : vector<8x128xf32> to vector<8x128xbf16>
    %c0_18 = arith.constant 0 : index
    %c0_19 = arith.constant 0 : index
    %28 = vector.load %arg8[%c0_18, %c0_19] : memref<8x128xbf16, #tpu.memory_space<vmem>>, vector<8x128xbf16>
    tpu.vector_store %arg8[%c0_18, %c0_19], %27 {strides = array<i32>} : memref<8x128xbf16, #tpu.memory_space<vmem>>, vector<8x128xbf16>,
    return
  }
  func.func @transform_0(%arg0: i32) -> (i32, i32) {
    %c0_i32 = arith.constant 0 : i32
    %c0_i32_0 = arith.constant 0 : i32
    return %arg0, %c0_i32 : i32, i32
  }
  func.func @transform_1(%arg0: i32) -> (i32, i32) {
    %c0_i32 = arith.constant 0 : i32
    %c0_i32_0 = arith.constant 0 : i32
    %c0_i32_1 = arith.constant 0 : i32
    return %c0_i32, %c0_i32_0 : i32, i32
  }
  func.func @transform_2(%arg0: i32) -> (i32, i32) {
    %c0_i32 = arith.constant 0 : i32
    %c0_i32_0 = arith.constant 0 : i32
    %c0_i32_1 = arith.constant 0 : i32
    return %c0_i32, %c0_i32_0 : i32, i32
  }
  func.func @transform_3(%arg0: i32) -> (i32, i32) {
    %c0_i32 = arith.constant 0 : i32
    %c0_i32_0 = arith.constant 0 : i32
    %c0_i32_1 = arith.constant 0 : i32
    return %c0_i32, %c0_i32_0 : i32, i32
  }
  func.func @transform_4(%arg0: i32) -> (i32, i32) {
    %c0_i32 = arith.constant 0 : i32
    %c0_i32_0 = arith.constant 0 : i32
    %c0_i32_1 = arith.constant 0 : i32
    return %c0_i32, %c0_i32_0 : i32, i32
  }
  func.func @transform_5(%arg0: i32) -> (i32, i32) {
    %c0_i32 = arith.constant 0 : i32
    %c0_i32_0 = arith.constant 0 : i32
    %c0_i32_1 = arith.constant 0 : i32
    return %c0_i32, %c0_i32_0 : i32, i32
  }
  func.func @transform_6(%arg0: i32) -> (i32, i32) {
    %c0_i32 = arith.constant 0 : i32
    %c0_i32_0 = arith.constant 0 : i32
    %c0_i32_1 = arith.constant 0 : i32
    return %c0_i32, %c0_i32_0 : i32, i32
  }
  func.func @transform_7(%arg0: i32) -> (i32, i32) {
    %c0_i32 = arith.constant 0 : i32
    %c0_i32_0 = arith.constant 0 : i32
    return %arg0, %c0_i32 : i32, i32
  }
}

</mosaic_0001>

<bundles_post_ra>
// kernel: tpu_custom_call.1
= control target key start
LH: loop header
LB: loop body
LE: loop exit
PB: predicated region body
PF: predicated region fallthrough
CT: control target
= control target key end

     0   :  { %13 = vsyncpa [#allocation4], 0  ;;  %s866_s0 = inlined_call_operand.hbm [shape: bf16[8,128], index: 0, kind: input, shape index: {}]   ;;  %s867_s1 = inlined_call_operand.hbm [shape: bf16[128,128], index: 1, kind: input, shape index: {}]   ;;  %s868_s2 = inlined_call_operand.vmem [shape: f32[1,128], index: 2, kind: input, shape index: {}]   ;;  %s869_s3 = inlined_call_operand.hbm [shape: bf16[128,128], index: 3, kind: input, shape index: {}]   ;;  %s870_s4 = inlined_call_operand.vmem [shape: f32[1,128], index: 4, kind: input, shape index: {}]   ;;  %s871_s5 = inlined_call_operand.hbm [shape: bf16[128,128], index: 5, kind: input, shape index: {}]   ;;  %s872_s6 = inlined_call_operand.<no memory space> [shape: f32[1,1], index: 6, kind: input, shape index: {}]   ;;  %s873_s7 = inlined_call_operand.hbm [shape: bf16[8,128], index: 7, kind: output, shape index: {}]  }
   0x1   :  { %14 = vsyncpa [#allocation7], 0 }
   0x2   :  { %15 = vsyncpa [#allocation10], 0 }
   0x3   :  { %16 = vsyncpa [#allocation5], 0  ;;  %s709_s24 = smov [#allocation6]   ;;  %s591_s28 = scalar_lea.hbm %s867_s1, 1024 }
   0x4   :  { %s32_s25 = sshll.u32 %s709_s24, 4  ;;  %p592_p0 = scmp.ne.s32.totalorder %s867_s1, %s591_s28  ;;  %s33_s25 = int_to_ptr.vmem [resolvable:$true] %s32_s25 }
   0x5   :  { %p595_p1 = scmp.lt.u32.totalorder %s591_s28, %s867_s1 }
   0x7   :  { %p597_p2 = pnand %p595_p1, %p592_p0 }
   0x9   :  { %600 = shalt.err (!%p597_p2)
}
   0xa   :  { %s601_s10 = scalar_lea.vmem %s33_s25, 1024  ;;  %p606_p4 = scmp.lt.s32.totalorder %s33_s25, %s33_s25 }
   0xb   :  { %p602_p3 = scmp.ne.s32.totalorder %s33_s25, %s601_s10  ;;  %p607_p5 = scmp.lt.s32.totalorder %s601_s10, %s601_s10 }
   0xd   :  { %p608_p6 = por %p607_p5, %p606_p4 }
   0xf   :  { %p609_p7 = pnand %p608_p6, %p602_p3 }
  0x11   :  { %612 = shalt.err (!%p609_p7)
}
  0x12   :  { %s710_s11 = smov 64   ;;  %s711_s12 = smov 4  }
  0x13   :  { %38 = dma.hbm_to_vmem [thread:$0]  %s867_s1, 1024, %s33_s25, [#allocation7], %s710_s11, %s710_s11, %s711_s12  }
  0x14   :  { %s712_s15 = smov [#allocation3]   ;;  %s713_s17 = smov [#allocation8]  }
  0x15   :  { %s23_s16 = sshll.u32 %s712_s15, 4  ;;  %s46_s18 = sshll.u32 %s713_s17, 4  ;;  %s24_s16 = int_to_ptr.vmem [resolvable:$true] %s23_s16  ;;  %s47_s18 = int_to_ptr.vmem [resolvable:$true] %s46_s18 }
  0x16   :  { %s613_s21 = scalar_lea.hbm %s866_s0, 64 }
  0x17   :  { %p614_p8 = scmp.ne.s32.totalorder %s866_s0, %s613_s21  ;;  %p617_p9 = scmp.lt.u32.totalorder %s613_s21, %s866_s0 }
  0x19   :  { %p619_p10 = pnand %p617_p9, %p614_p8 }
  0x1b   :  { %622 = shalt.err (!%p619_p10)
}
  0x1c   :  { %s623_s1 = scalar_lea.vmem %s24_s16, 64  ;;  %p628_p12 = scmp.lt.s32.totalorder %s24_s16, %s24_s16 }
  0x1d   :  { %p624_p11 = scmp.ne.s32.totalorder %s24_s16, %s623_s1  ;;  %p629_p13 = scmp.lt.s32.totalorder %s623_s1, %s623_s1 }
  0x1f   :  { %p630_p0 = por %p629_p13, %p628_p12 }
  0x21   :  { %p631_p1 = pnand %p630_p0, %p624_p11 }
  0x23   :  { %634 = shalt.err (!%p631_p1)
}
  0x24   :  { %26 = dma.hbm_to_vmem [thread:$0]  %s866_s0, 64, %s24_s16, [#allocation4]  }
  0x25   :  { %s635_s30 = scalar_lea.hbm %s869_s3, 1024 }
  0x26   :  { %p636_p2 = scmp.ne.s32.totalorder %s869_s3, %s635_s30  ;;  %p639_p3 = scmp.lt.u32.totalorder %s635_s30, %s869_s3 }
  0x28   :  { %p641_p4 = pnand %p639_p3, %p636_p2 }
  0x2a   :  { %644 = shalt.err (!%p641_p4)
}
  0x2b   :  { %s645_s14 = scalar_lea.vmem %s47_s18, 1024  ;;  %p650_p6 = scmp.lt.s32.totalorder %s47_s18, %s47_s18 }
  0x2c   :  { %p646_p5 = scmp.ne.s32.totalorder %s47_s18, %s645_s14  ;;  %p651_p7 = scmp.lt.s32.totalorder %s645_s14, %s645_s14 }
  0x2e   :  { %p652_p8 = por %p651_p7, %p650_p6 }
  0x30   :  { %p653_p9 = pnand %p652_p8, %p646_p5 }
  0x32   :  { %656 = shalt.err (!%p653_p9)
}
  0x33   :  { %52 = dma.hbm_to_vmem [thread:$0]  %s869_s3, 1024, %s47_s18, [#allocation7], %s710_s11, %s710_s11, %s711_s12  }
  0x34   :  { %s714_s16 = smov [#allocation9]   ;;  %s657_s21 = scalar_lea.hbm %s871_s5, 1024 }
  0x35   :  { %s60_s17 = sshll.u32 %s714_s16, 4  ;;  %p658_p10 = scmp.ne.s32.totalorder %s871_s5, %s657_s21  ;;  %s61_s17 = int_to_ptr.vmem [resolvable:$true] %s60_s17 }
  0x36   :  { %p661_p11 = scmp.lt.u32.totalorder %s657_s21, %s871_s5 }
  0x38   :  { %p663_p12 = pnand %p661_p11, %p658_p10 }
  0x3a   :  { %666 = shalt.err (!%p663_p12)
}
  0x3b   :  { %s667_s1 = scalar_lea.vmem %s61_s17, 1024  ;;  %p672_p0 = scmp.lt.s32.totalorder %s61_s17, %s61_s17 }
  0x3c   :  { %p668_p13 = scmp.ne.s32.totalorder %s61_s17, %s667_s1  ;;  %p673_p1 = scmp.lt.s32.totalorder %s667_s1, %s667_s1 }
  0x3e   :  { %p674_p2 = por %p673_p1, %p672_p0 }
  0x40   :  { %p675_p3 = pnand %p674_p2, %p668_p13 }
  0x42   :  { %678 = shalt.err (!%p675_p3)
}
  0x43   :  { %66 = dma.hbm_to_vmem [thread:$0]  %s871_s5, 1024, %s61_s17, [#allocation10], %s710_s11, %s710_s11, %s711_s12  }
  0x44   :  { %701 = dma.done.wait [#allocation4], 64  }
  0x45   :  { %702 = vsyncadd [#allocation4], 4294967232 }
  0x46   :  { %703 = dma.done.wait [#allocation7], 2048  }
  0x47   :  { %704 = vsyncadd [#allocation7], 4294965248 }
  0x48   :  { %705 = dma.done.wait [#allocation10], 1024  }
  0x49   :  { %706 = vsyncadd [#allocation10], 4294966272  ;;  %v715_v0 = vmov 0.0   ;;  %vm716_vm0 = vmmov 0   ;;  %v563_v1 = vld [vmem:[#allocation6] sm:$0xff]   ;;  %v564_v2 = vld [vmem:[#allocation6 + $0x8] sm:$0xff]   ;;  %v326_v42 = vstv %s872_s6 }
  0x4a   :  { %494 = vmatprep.subr.bf16.mxu0 %v715_v0  ;;  %510 = vmatprep.mubr.msk.bf16.mxu0 %vm716_vm0, %v715_v0  ;;  %v565_v3 = vld [vmem:[#allocation6 + $0x10] sm:$0xff]   ;;  %v571_v4 = vld [vmem:[#allocation8] sm:$0xff]   ;;  %v566_v5 = vld [vmem:[#allocation6 + $0x18] sm:$0xff]  }
  0x4b   :  { %514 = vmatprep.subr.bf16.mxu1 %v715_v0  ;;  %530 = vmatprep.mubr.msk.bf16.mxu1 %vm716_vm0, %v715_v0  ;;  %v572_v6 = vld [vmem:[#allocation8 + $0x8] sm:$0xff]   ;;  %v567_v7 = vld [vmem:[#allocation6 + $0x20] sm:$0xff]   ;;  %v573_v8 = vld [vmem:[#allocation8 + $0x10] sm:$0xff]  }
  0x4c   :  { %495 = vmatpush3.bf16.msra.mxu0 %v563_v1  ;;  %515 = vmatpush3.bf16.msra.mxu1 %v571_v4  ;;  %v568_v9 = vld [vmem:[#allocation6 + $0x28] sm:$0xff]   ;;  %v574_v10 = vld [vmem:[#allocation8 + $0x18] sm:$0xff]   ;;  %v569_v11 = vld [vmem:[#allocation6 + $0x30] sm:$0xff]  }
  0x4d   :  { %496 = vmatprep.subr.bf16.mxu0 %v715_v0  ;;  %516 = vmatprep.subr.bf16.mxu1 %v715_v0  ;;  %v575_v12 = vld [vmem:[#allocation8 + $0x20] sm:$0xff]   ;;  %v570_v13 = vld [vmem:[#allocation6 + $0x38] sm:$0xff]   ;;  %v576_v14 = vld [vmem:[#allocation8 + $0x28] sm:$0xff]  }
  0x4e   :  { %v82_v15 = vld [vmem:[#allocation3] sm:$0xf]  ;;  %v577_v16 = vld [vmem:[#allocation8 + $0x30] sm:$0xff]   ;;  %v579_v18 = vld [vmem:[#allocation9] sm:$0xff]  }
  0x4f   :  { %v578_v17 = vld [vmem:[#allocation8 + $0x38] sm:$0xff]   ;;  %v580_v19 = vld [vmem:[#allocation9 + $0x8] sm:$0xff]   ;;  %v581_v20 = vld [vmem:[#allocation9 + $0x10] sm:$0xff]  }
  0x50   :  { %497 = vmatpush3.bf16.msra.mxu0 %v564_v2  ;;  %517 = vmatpush3.bf16.msra.mxu1 %v572_v6  ;;  %v582_v21 = vld [vmem:[#allocation9 + $0x18] sm:$0xff]   ;;  %v583_v22 = vld [vmem:[#allocation9 + $0x20] sm:$0xff]   ;;  %v584_v23 = vld [vmem:[#allocation9 + $0x28] sm:$0xff]  }
  0x51   :  { %498 = vmatprep.subr.bf16.mxu0 %v715_v0  ;;  %518 = vmatprep.subr.bf16.mxu1 %v715_v0  ;;  %v440_v24 = vld [vmem:[%s868_s2] ss:$0 sm:$0xff]  ;;  %v585_v32 = vld [vmem:[#allocation9 + $0x30] sm:$0xff]  }
  0x52   :  { %v586_v33 = vld [vmem:[#allocation9 + $0x38] sm:$0xff]  }
  0x53   :  { %v449_v34 = vld [vmem:[%s870_s4] ss:$0 sm:$0xff]  ;;  %s717_s4 = smov [#allocation11]  }
  0x54   :  { %499 = vmatpush3.bf16.msra.mxu0 %v565_v3  ;;  %519 = vmatpush3.bf16.msra.mxu1 %v573_v8  ;;  %s429_s28 = sshll.u32 %s717_s4, 4  ;;  %s430_s28 = int_to_ptr.vmem [resolvable:$true] %s429_s28 }
  0x55   :  { %500 = vmatprep.subr.bf16.mxu0 %v715_v0  ;;  %520 = vmatprep.subr.bf16.mxu1 %v715_v0  ;;  %s679_s29 = scalar_lea.vmem %s430_s28, 64  ;;  %p684_p5 = scmp.lt.s32.totalorder %s430_s28, %s430_s28 }
  0x56   :  { %p680_p4 = scmp.ne.s32.totalorder %s430_s28, %s679_s29  ;;  %p685_p6 = scmp.lt.s32.totalorder %s679_s29, %s679_s29 }
  0x58   :  { %501 = vmatpush3.bf16.msra.mxu0 %v566_v5  ;;  %521 = vmatpush3.bf16.msra.mxu1 %v574_v10  ;;  %p686_p7 = por %p685_p6, %p684_p5 }
  0x59   :  { %502 = vmatprep.subr.bf16.mxu0 %v715_v0  ;;  %522 = vmatprep.subr.bf16.mxu1 %v715_v0 }
  0x5a   :  { %p687_p8 = pnand %p686_p7, %p680_p4 }
  0x5c   :  { %503 = vmatpush3.bf16.msra.mxu0 %v567_v7  ;;  %523 = vmatpush3.bf16.msra.mxu1 %v575_v12 }
  0x5d   :  { %504 = vmatprep.subr.bf16.mxu0 %v715_v0  ;;  %524 = vmatprep.subr.bf16.mxu1 %v715_v0 }
  0x60   :  { %505 = vmatpush3.bf16.msra.mxu0 %v568_v9  ;;  %525 = vmatpush3.bf16.msra.mxu1 %v576_v14 }
  0x61   :  { %506 = vmatprep.subr.bf16.mxu0 %v715_v0  ;;  %526 = vmatprep.subr.bf16.mxu1 %v715_v0 }
  0x64   :  { %507 = vmatpush3.bf16.msra.mxu0 %v569_v11  ;;  %527 = vmatpush3.bf16.msra.mxu1 %v577_v16 }
  0x65   :  { %508 = vmatprep.subr.bf16.mxu0 %v715_v0  ;;  %528 = vmatprep.subr.bf16.mxu1 %v715_v0 }
  0x68   :  { %509 = vmatpush3.bf16.msra.mxu0 %v570_v13  ;;  %529 = vmatpush3.bf16.msra.mxu1 %v578_v17 }
  0x69   :  { %534 = vmatprep.subr.bf16.mxu0 %v715_v0 }
  0x6b   :  { %511 = vmatmul.mubr.bf16.vlgmr.msra.gmra.mrb[0].mxu0 %v82_v15 }
  0x6c   :  { %550 = vmatprep.mubr.msk.bf16.mxu0 %vm716_vm0, %v715_v0  ;;  %535 = vmatpush3.bf16.msra.mxu0 %v579_v18 }
  0x6d   :  { %536 = vmatprep.subr.bf16.mxu0 %v715_v0 }
  0x70   :  { %537 = vmatpush3.bf16.msra.mxu0 %v580_v19 }
  0x71   :  { %538 = vmatprep.subr.bf16.mxu0 %v715_v0 }
  0x74   :  { %539 = vmatpush3.bf16.msra.mxu0 %v581_v20 }
  0x75   :  { %540 = vmatprep.subr.bf16.mxu0 %v715_v0 }
  0x78   :  { %541 = vmatpush3.bf16.msra.mxu0 %v582_v21 }
  0x79   :  { %542 = vmatprep.subr.bf16.mxu0 %v715_v0 }
  0x7c   :  { %543 = vmatpush3.bf16.msra.mxu0 %v583_v22 }
  0x7d   :  { %544 = vmatprep.subr.bf16.mxu0 %v715_v0 }
  0x80   :  { %545 = vmatpush3.bf16.msra.mxu0 %v584_v23 }
  0x81   :  { %546 = vmatprep.subr.bf16.mxu0 %v715_v0 }
  0x84   :  { %547 = vmatpush3.bf16.msra.mxu0 %v585_v32 }
  0x85   :  { %548 = vmatprep.subr.bf16.mxu0 %v715_v0 }
  0x88   :  { %549 = vmatpush3.bf16.msra.mxu0 %v586_v33 }
 0x13e   :  { %v188_v25 = vpop.f32.mrb[0].mxu0 }
 0x13f   :  { %v189_v26 = vadd.f32 %v440_v24, %v188_v25  ;;  %v512_v27 = vpop.f32.mrb[1].mxu0 }
 0x140   :  { %v191_v28 = vpop.f32.mrb[2].mxu0 }
 0x141   :  { %v194_v29 = vmax.f32 %v189_v26, 0.0  ;;  %v513_v30 = vpop.f32.mrb[3].mxu0 }
 0x143   :  { %v195_v31 = vpack.c.bf16 %v194_v29, %v194_v29 }
 0x145   :  { %531 = vmatmul.mubr.bf16.vlgmr.msra.gmra.mrb[0].mxu1 %v195_v31 }
 0x218   :  { %v301_v35 = vpop.f32.mrb[0].mxu1 }
 0x219   :  { %v302_v36 = vadd.f32 %v449_v34, %v301_v35  ;;  %v532_v37 = vpop.f32.mrb[1].mxu1 }
 0x21a   :  { %v304_v38 = vpop.f32.mrb[2].mxu1 }
 0x21b   :  { %v307_v39 = vmax.f32 %v302_v36, 0.0  ;;  %v533_v40 = vpop.f32.mrb[3].mxu1 }
 0x21d   :  { %v308_v41 = vpack.c.bf16 %v307_v39, %v307_v39 }
 0x21f   :  { %551 = vmatmul.mubr.bf16.vlgmr.msra.gmra.mrb[4].mxu0 %v308_v41 }
 0x2f2   :  { %v409_v43 = vpop.f32.mrb[4].mxu0 }
 0x2f3   :  { %v410_v44 = vadd.f32 %v409_v43, %v326_v42  ;;  %v552_v45 = vpop.f32.mrb[5].mxu0 }
 0x2f4   :  { %v412_v46 = vpop.f32.mrb[6].mxu0 }
 0x2f5   :  { %v466_v47 = vmul.f32 -1.442695, %v410_v44  ;;  %v553_v48 = vpop.f32.mrb[7].mxu0 }
 0x2f7   :  { %587 = vpow2.f32 %v466_v47 }
 0x301   :  { %v588_v49 = vpop.eup %587 }
 0x302   :  { %v418_v50 = vadd.f32 1.0, %v588_v49 }
 0x304   :  { %589 = vrcp.f32 %v418_v50 }
 0x30e   :  { %v590_v51 = vpop.eup %589 }
 0x30f   :  { %v421_v52 = vpack.c.bf16 %v590_v51, %v590_v51 }
 0x311   :  { %422 = vst [vmem:[#allocation11] sm:$0xf] %v421_v52 }
 0x312   :  { %690 = shalt.err (!%p687_p8)
}
 0x313   :  { %s691_s8 = scalar_lea.hbm %s873_s7, 64 }
 0x314   :  { %p692_p9 = scmp.ne.s32.totalorder %s873_s7, %s691_s8  ;;  %p695_p10 = scmp.lt.u32.totalorder %s691_s8, %s873_s7 }
 0x316   :  { %p697_p11 = pnand %p695_p10, %p692_p9 }
 0x318   :  { %700 = shalt.err (!%p697_p11)
}
 0x319   :  { %432 = dma.vmem_to_hbm [thread:$0]  %s430_s28, 64, %s873_s7, [#allocation5]  }
 0x31a   :  { %707 = dma.done.wait [#allocation5], 64  }
 0x31b   :  { %708 = vsyncadd [#allocation5], 4294967232 }
 0x31c   :  { %436 = vsyncpa [#allocation4], 1 }
 0x31d   :  { %437 = vsyncpa [#allocation7], 1 }
 0x31e   :  { %438 = vsyncpa [#allocation10], 1 }
 0x31f   :  { %439 = vsyncpa [#allocation5], 1 }

</bundles_post_ra>
